<compile_context>
chip_gen: v7x
topology: tpu7x:2x2x1
jax: 0.10.0
libtpu: 0.0.40
codegen_flags: <defaults>
</compile_context>

<pallas_src>
import functools

import jax
import jax.numpy as jnp
from jax import lax
from jax.experimental import pallas as pl
from jax.experimental.pallas import tpu as pltpu


# --------------------------------------------------------------------------
# Kernels
# --------------------------------------------------------------------------

def _bn_fused_kernel(x_ref, gamma_ref, beta_ref, out_ref, mean_ref, var_ref,
                     *, eps, inv_count):
    """Single pass: x resident in VMEM -> stats -> normalize (2x HBM traffic)."""
    x = x_ref[...].astype(jnp.float32)                              # (N, C, S)
    s1 = jnp.sum(jnp.sum(x, axis=2, keepdims=True), axis=0)         # (C, 1) — C on sublanes
    s2 = jnp.sum(jnp.sum(x * x, axis=2, keepdims=True), axis=0)     # (C, 1)
    mean = s1 * inv_count
    var = jnp.maximum(s2 * inv_count - mean * mean, 0.0)            # biased var (matches module)
    inv_std = lax.rsqrt(var + eps)
    scale = gamma_ref[...].astype(jnp.float32) * inv_std            # (C, 1)
    shift = beta_ref[...].astype(jnp.float32) - mean * scale        # (C, 1)
    out_ref[...] = (x * scale[None, :, :] + shift[None, :, :]).astype(out_ref.dtype)
    mean_ref[...] = mean
    var_ref[...] = var


def _bn_stats_kernel(x_ref, sum_ref, sumsq_ref):
    """Pass 1: accumulate per-(batch-group, channel) partial sum / sumsq."""
    @pl.when(pl.program_id(1) == 0)
    def _init():
        sum_ref[...] = jnp.zeros_like(sum_ref)
        sumsq_ref[...] = jnp.zeros_like(sumsq_ref)

    x = x_ref[...].astype(jnp.float32)                      # (N_TILE, C, S_TILE)
    ps = jnp.sum(x, axis=2, keepdims=True)                  # lane reduce -> (N_TILE, C, 1)
    ps2 = jnp.sum(x * x, axis=2, keepdims=True)
    # C stays on sublanes; accumulators are (1, C, 1) -> no relayout.
    sum_ref[...] += jnp.sum(ps, axis=0, keepdims=True)
    sumsq_ref[...] += jnp.sum(ps2, axis=0, keepdims=True)


def _bn_apply_kernel(x_ref, scale_ref, shift_ref, out_ref):
    """Pass 2: streaming normalize, out = x * scale + shift (2 VALU ops/elem)."""
    x = x_ref[...].astype(jnp.float32)                      # (N_TILE, C, S_TILE)
    scale = scale_ref[...][None, :, :]                      # (1, C, 1) — C on sublanes
    shift = shift_ref[...][None, :, :]
    out_ref[...] = (x * scale + shift).astype(out_ref.dtype)


# --------------------------------------------------------------------------
# Sizing helpers
# --------------------------------------------------------------------------

def _hw_budgets():
    """(vmem_limit_bytes, target_block_bytes) from the actual chip, with fallback."""
    cap = 64 * 1024 * 1024
    try:
        info = pltpu.get_tpu_info()
        cap = int(getattr(info, "vmem_capacity_bytes", cap)) or cap
    except Exception:
        pass
    vmem_limit = min(int(cap * 3 // 4), 100 * 1024 * 1024)
    # ~4 MiB blocks on 64 MiB-VMEM parts (v7x), ~8 MiB on 128 MiB parts (v5e/v6e).
    target_block = 4 * 1024 * 1024 if cap <= 64 * 1024 * 1024 else 8 * 1024 * 1024
    return vmem_limit, target_block


def _pick_tiles(N, C, S, itemsize, target_block_bytes):
    """Pick (N_TILE, S_TILE) so one x block is ~target_block_bytes in VMEM."""
    c_pad = ((C + 7) // 8) * 8                    # sublane padding
    if S % 128 == 0:
        cap = max(128, (target_block_bytes // (c_pad * itemsize)) // 128 * 128)
        s_tile = min(S, cap)
        while S % s_tile != 0:
            s_tile -= 128
    else:
        # Full-extent last dim (valid BlockSpec); caller guarantees it fits.
        s_tile = S
    s_bytes = c_pad * (((s_tile + 127) // 128) * 128) * itemsize
    if s_tile == S:
        # Whole spatial extent fits -> span multiple batch samples per block.
        n_tile = max(1, min(N, target_block_bytes // s_bytes))
        while N % n_tile != 0:
            n_tile -= 1
    else:
        n_tile = 1
    return n_tile, s_tile


# --------------------------------------------------------------------------
# Forward wrapper
# --------------------------------------------------------------------------

def batch_norm_forward(x, weight, bias, running_mean, running_var,
                       num_batches_tracked, *, momentum=0.1, eps=1e-5,
                       affine=True, target_block_bytes=None,
                       max_fused_bytes=None):
    """Replicates BatchNorm.forward (training-mode batch stats, buffer updates).

    `target_block_bytes` / `max_fused_bytes` are test hooks to force specific
    tiling / the two-pass path at small shapes.
    """
    input_shape = x.shape
    N, C = input_shape[0], input_shape[1]
    x3 = x.reshape(N, C, -1)                      # free reshape, no HBM transpose
    S_orig = x3.shape[2]
    itemsize = x.dtype.itemsize

    vmem_limit, default_target = _hw_budgets()
    tgt = default_target if target_block_bytes is None else target_block_bytes
    max_single_block = vmem_limit // 8            # biggest un-tileable block we accept
    fused_cap = (vmem_limit // 6) if max_fused_bytes is None else max_fused_bytes

    # Lane alignment robustness: if S is not a multiple of 128 AND a full-S
    # block would not fit, zero-pad S (zeros contribute 0 to sum/sumsq; the
    # true count is used below and the pad is sliced off the output).
    S = S_orig
    if S % 128 != 0:
        s_padded = ((S + 127) // 128) * 128
        c_pad = ((C + 7) // 8) * 8
        if c_pad * s_padded * itemsize > max_single_block:
            x3 = jnp.pad(x3, ((0, 0), (0, 0), (0, s_padded - S)))
            S = s_padded

    numel = N * C * S
    inv_count = 1.0 / float(N * S_orig)

    if affine:
        gamma = weight.reshape(C).astype(jnp.float32)
        beta = bias.reshape(C).astype(jnp.float32)
    else:
        gamma = jnp.ones((C,), jnp.float32)
        beta = jnp.zeros((C,), jnp.float32)

    cvec_spec = pl.BlockSpec((C, 1), lambda *_: (0, 0))
    use_fused = (numel * 4) <= fused_cap          # f32 working copy must fit comfortably

    if use_fused:
        # ---- Fused single pass: read x once, write out once (2x traffic) ----
        kern = functools.partial(_bn_fused_kernel, eps=eps, inv_count=inv_count)
        full_spec = pl.BlockSpec((N, C, S), lambda i: (0, 0, 0))
        out3, mean_cl, var_cl = pl.pallas_call(
            kern,
            grid=(1,),
            in_specs=[full_spec, cvec_spec, cvec_spec],
            out_specs=(full_spec, cvec_spec, cvec_spec),
            out_shape=(
                jax.ShapeDtypeStruct((N, C, S), x.dtype),
                jax.ShapeDtypeStruct((C, 1), jnp.float32),
                jax.ShapeDtypeStruct((C, 1), jnp.float32),
            ),
            compiler_params=pltpu.CompilerParams(
                dimension_semantics=("arbitrary",),
                vmem_limit_bytes=vmem_limit),
            cost_estimate=pl.CostEstimate(
                flops=5 * numel, transcendentals=C,
                bytes_accessed=2 * numel * itemsize + 4 * C * 4),
        )(x3, gamma.reshape(C, 1), beta.reshape(C, 1))
        mean = mean_cl.reshape(C)
        var = var_cl.reshape(C)
    else:
        # ---- Two-pass path for large activations ----
        n_tile, s_tile = _pick_tiles(N, C, S, itemsize, tgt)
        G = N // n_tile
        n_s = S // s_tile
        x_spec = pl.BlockSpec((n_tile, C, s_tile), lambda g, s: (g, 0, s))
        part_spec = pl.BlockSpec((1, C, 1), lambda g, s: (g, 0, 0))

        # Pass 1: per-group partial sums; leading axis "parallel" so v7x's two
        # TensorCores split the stats reduction (no cross-group dependency).
        sums, sumsqs = pl.pallas_call(
            _bn_stats_kernel,
            grid=(G, n_s),
            in_specs=[x_spec],
            out_specs=(part_spec, part_spec),
            out_shape=(
                jax.ShapeDtypeStruct((G, C, 1), jnp.float32),
                jax.ShapeDtypeStruct((G, C, 1), jnp.float32),
            ),
            compiler_params=pltpu.CompilerParams(
                dimension_semantics=("parallel", "arbitrary"),
                vmem_limit_bytes=vmem_limit),
            cost_estimate=pl.CostEstimate(
                flops=3 * numel, transcendentals=0,
                bytes_accessed=numel * itemsize + 2 * G * C * 4),
        )(x3)

        # Finalize in C-sized JAX glue (combines per-group f32 partials).
        sum_c = jnp.sum(sums, axis=0).reshape(C)
        sumsq_c = jnp.sum(sumsqs, axis=0).reshape(C)
        mean = sum_c * inv_count
        var = jnp.maximum(sumsq_c * inv_count - mean * mean, 0.0)
        inv_std = lax.rsqrt(var + eps)
        scale_flat = gamma * inv_std
        shift_flat = beta - mean * scale_flat
        scale = scale_flat.reshape(C, 1)
        shift = shift_flat.reshape(C, 1)

        # Pass 2: streaming normalize, fully parallel (megacore-friendly).
        out3 = pl.pallas_call(
            _bn_apply_kernel,
            grid=(G, n_s),
            in_specs=[x_spec, cvec_spec, cvec_spec],
            out_specs=x_spec,
            out_shape=jax.ShapeDtypeStruct((N, C, S), x.dtype),
            compiler_params=pltpu.CompilerParams(
                dimension_semantics=("parallel", "parallel"),
                vmem_limit_bytes=vmem_limit),
            cost_estimate=pl.CostEstimate(
                flops=2 * numel, transcendentals=0,
                bytes_accessed=2 * numel * itemsize + 2 * C * 4),
        )(x3, scale, shift)

    if S != S_orig:
        out3 = out3[:, :, :S_orig]
    out = out3.reshape(input_shape)

    # Running-stat updates (C-sized glue). The reference module's
    # `if self.train():` is always truthy and mixes the *biased* batch
    # variance into running_var — keep that exact semantics.
    new_running_mean = (1.0 - momentum) * running_mean + momentum * mean
    new_running_var = (1.0 - momentum) * running_var + momentum * var
    new_num_batches_tracked = num_batches_tracked + 1

    # TODO(synk): alternative (N, C, S//128, 128) layout for C < 8 (full vreg
    # occupancy for tiny-channel BN) not implemented; fused path covers the
    # small shapes where it matters most.
    # TODO(synk): the module's hand-written backward()/self.cache bookkeeping
    # is not part of the forward contract and is not implemented here.

    return out, new_running_mean, new_running_var, new_num_batches_tracked


# --------------------------------------------------------------------------
# Reference + test
# --------------------------------------------------------------------------

def _reference_forward(x, weight, bias, eps):
    N, C = x.shape[0], x.shape[1]
    x3 = x.reshape(N, C, -1).astype(jnp.float32)
    mean = x3.mean(axis=(0, 2))
    var = ((x3 - mean[None, :, None]) ** 2).mean(axis=(0, 2))
    inv_std = (var + eps) ** -0.5
    x_norm = (x3 - mean[None, :, None]) * inv_std[None, :, None]
    out = x_norm * weight[None, :, None] + bias[None, :, None]
    return out.reshape(x.shape).astype(x.dtype), mean, var


if __name__ == "__main__":
    key = jax.random.PRNGKey(0)
    k_x, k_w, k_b = jax.random.split(key, 3)

    N, C, H, W = 2, 4, 16, 16
    eps = 1e-5
    momentum = 0.1

    x = jax.random.normal(k_x, (N, C, H, W), dtype=jnp.float32)
    # torch.Tensor(num_features) is uninitialized; init deterministically here.
    weight = jax.random.normal(k_w, (C,), dtype=jnp.float32)
    bias = jax.random.normal(k_b, (C,), dtype=jnp.float32)
    running_mean = jnp.zeros((C,), jnp.float32)
    running_var = jnp.ones((C,), jnp.float32)
    num_batches_tracked = jnp.array(0, jnp.int32)

    ref, bm, bv = _reference_forward(x, weight, bias, eps)

    # 1) Default dispatch (small x -> fused single-pass kernel).
    out, rmean, rvar, nbt = batch_norm_forward(
        x, weight, bias, running_mean, running_var, num_batches_tracked,
        momentum=momentum, eps=eps, affine=True)
    out = jax.block_until_ready(out)
    assert out.shape == x.shape and out.dtype == x.dtype
    assert jnp.allclose(out, ref, atol=1e-4, rtol=1e-4)
    assert jnp.allclose(rmean, (1 - momentum) * running_mean + momentum * bm,
                        atol=1e-4, rtol=1e-4)
    assert jnp.allclose(rvar, (1 - momentum) * running_var + momentum * bv,
                        atol=1e-4, rtol=1e-4)
    assert int(nbt) == 1

    # 2) Force the two-pass path (default tiles -> batch-spanning block).
    out2, _, _, _ = batch_norm_forward(
        x, weight, bias, running_mean, running_var, num_batches_tracked,
        momentum=momentum, eps=eps, affine=True, max_fused_bytes=0)
    out2 = jax.block_until_ready(out2)
    assert jnp.allclose(out2, ref, atol=1e-4, rtol=1e-4)

    # 3) Force the two-pass path with tiny tiles (multi-step accumulation).
    out3, _, _, _ = batch_norm_forward(
        x, weight, bias, running_mean, running_var, num_batches_tracked,
        momentum=momentum, eps=eps, affine=True,
        max_fused_bytes=0, target_block_bytes=4096)
    out3 = jax.block_until_ready(out3)
    assert jnp.allclose(out3, ref, atol=1e-4, rtol=1e-4)

    print("KERNEL_OK")
</pallas_src>

<mosaic_0001>
module attributes {stable_mosaic.version = 11 : i64} {
  func.func @_bn_fused_kernel(%arg0: i32, %arg1: memref<2x4x256xf32, #tpu.memory_space<vmem>>, %arg2: memref<4x1xf32, #tpu.memory_space<vmem>>, %arg3: memref<4x1xf32, #tpu.memory_space<vmem>>, %arg4: memref<2x4x256xf32, #tpu.memory_space<vmem>>, %arg5: memref<4x1xf32, #tpu.memory_space<vmem>>, %arg6: memref<4x1xf32, #tpu.memory_space<vmem>>) attributes {dimension_semantics = [#tpu.dimension_semantics<arbitrary>], iteration_bounds = array<i64: 1>, scalar_prefetch = 0 : i64, scratch_operands = 0 : i64, tpu.core_type = #tpu.core_type<tc>, window_params = [{pipeline_mode = #tpu.pipeline_mode<synchronous>, transform_indices = @transform_0, window_bounds = array<i64: 2, 4, 256>}, {pipeline_mode = #tpu.pipeline_mode<synchronous>, transform_indices = @transform_1, window_bounds = array<i64: 4, 1>}, {pipeline_mode = #tpu.pipeline_mode<synchronous>, transform_indices = @transform_2, window_bounds = array<i64: 4, 1>}, {pipeline_mode = #tpu.pipeline_mode<synchronous>, transform_indices = @transform_3, window_bounds = array<i64: 2, 4, 256>}, {pipeline_mode = #tpu.pipeline_mode<synchronous>, transform_indices = @transform_4, window_bounds = array<i64: 4, 1>}, {pipeline_mode = #tpu.pipeline_mode<synchronous>, transform_indices = @transform_5, window_bounds = array<i64: 4, 1>}]} {
    %c0 = arith.constant 0 : index
    %c0_0 = arith.constant 0 : index
    %c0_1 = arith.constant 0 : index
    %0 = vector.load %arg1[%c0, %c0_0, %c0_1] : memref<2x4x256xf32, #tpu.memory_space<vmem>>, vector<2x4x256xf32>
    %cst = arith.constant dense<0.000000e+00> : vector<2x4xf32>
    %1 = vector.multi_reduction <add>, %0, %cst [2] : vector<2x4x256xf32> to vector<2x4xf32>
    %2 = vector.shape_cast %1 : vector<2x4xf32> to vector<2x4x1xf32>
    %cst_2 = arith.constant dense<0.000000e+00> : vector<4x1xf32>
    %3 = vector.multi_reduction <add>, %2, %cst_2 [0] : vector<2x4x1xf32> to vector<4x1xf32>
    %4 = arith.mulf %0, %0 : vector<2x4x256xf32>
    %cst_3 = arith.constant dense<0.000000e+00> : vector<2x4xf32>
    %5 = vector.multi_reduction <add>, %4, %cst_3 [2] : vector<2x4x256xf32> to vector<2x4xf32>
    %6 = vector.shape_cast %5 : vector<2x4xf32> to vector<2x4x1xf32>
    %cst_4 = arith.constant dense<0.000000e+00> : vector<4x1xf32>
    %7 = vector.multi_reduction <add>, %6, %cst_4 [0] : vector<2x4x1xf32> to vector<4x1xf32>
    %cst_5 = arith.constant 0.001953125 : f32
    %8 = vector.broadcast %cst_5 : f32 to vector<4x1xf32>
    %9 = arith.mulf %3, %8 : vector<4x1xf32>
    %cst_6 = arith.constant 0.001953125 : f32
    %10 = vector.broadcast %cst_6 : f32 to vector<4x1xf32>
    %11 = arith.mulf %7, %10 : vector<4x1xf32>
    %12 = arith.mulf %9, %9 : vector<4x1xf32>
    %13 = arith.subf %11, %12 : vector<4x1xf32>
    %cst_7 = arith.constant 0.000000e+00 : f32
    %14 = vector.broadcast %cst_7 : f32 to vector<4x1xf32>
    %15 = arith.maximumf %13, %14 : vector<4x1xf32>
    %cst_8 = arith.constant 9.99999974E-6 : f32
    %16 = vector.broadcast %cst_8 : f32 to vector<4x1xf32>
    %17 = arith.addf %15, %16 : vector<4x1xf32>
    %18 = math.rsqrt %17 : vector<4x1xf32>
    %c0_9 = arith.constant 0 : index
    %c0_10 = arith.constant 0 : index
    %19 = vector.load %arg2[%c0_9, %c0_10] : memref<4x1xf32, #tpu.memory_space<vmem>>, vector<4x1xf32>
    %20 = arith.mulf %19, %18 : vector<4x1xf32>
    %c0_11 = arith.constant 0 : index
    %c0_12 = arith.constant 0 : index
    %21 = vector.load %arg3[%c0_11, %c0_12] : memref<4x1xf32, #tpu.memory_space<vmem>>, vector<4x1xf32>
    %22 = arith.mulf %9, %20 : vector<4x1xf32>
    %23 = arith.subf %21, %22 : vector<4x1xf32>
    %24 = vector.shape_cast %20 : vector<4x1xf32> to vector<1x4x1xf32>
    %25 = vector.broadcast %24 : vector<1x4x1xf32> to vector<2x4x256xf32>
    %26 = arith.mulf %0, %25 : vector<2x4x256xf32>
    %27 = vector.shape_cast %23 : vector<4x1xf32> to vector<1x4x1xf32>
    %28 = vector.broadcast %27 : vector<1x4x1xf32> to vector<2x4x256xf32>
    %29 = arith.addf %26, %28 : vector<2x4x256xf32>
    %c0_13 = arith.constant 0 : index
    %c0_14 = arith.constant 0 : index
    %c0_15 = arith.constant 0 : index
    %30 = vector.load %arg4[%c0_13, %c0_14, %c0_15] : memref<2x4x256xf32, #tpu.memory_space<vmem>>, vector<2x4x256xf32>
    tpu.vector_store %arg4[%c0_13, %c0_14, %c0_15], %29 {strides = array<i32>} : memref<2x4x256xf32, #tpu.memory_space<vmem>>, vector<2x4x256xf32>,
    %c0_16 = arith.constant 0 : index
    %c0_17 = arith.constant 0 : index
    %31 = vector.load %arg5[%c0_16, %c0_17] : memref<4x1xf32, #tpu.memory_space<vmem>>, vector<4x1xf32>
    tpu.vector_store %arg5[%c0_16, %c0_17], %9 {strides = array<i32>} : memref<4x1xf32, #tpu.memory_space<vmem>>, vector<4x1xf32>,
    %c0_18 = arith.constant 0 : index
    %c0_19 = arith.constant 0 : index
    %32 = vector.load %arg6[%c0_18, %c0_19] : memref<4x1xf32, #tpu.memory_space<vmem>>, vector<4x1xf32>
    tpu.vector_store %arg6[%c0_18, %c0_19], %15 {strides = array<i32>} : memref<4x1xf32, #tpu.memory_space<vmem>>, vector<4x1xf32>,
    return
  }
  func.func @transform_0(%arg0: i32) -> (i32, i32, i32) {
    %c0_i32 = arith.constant 0 : i32
    %c0_i32_0 = arith.constant 0 : i32
    %c0_i32_1 = arith.constant 0 : i32
    %c0_i32_2 = arith.constant 0 : i32
    return %c0_i32, %c0_i32_0, %c0_i32_1 : i32, i32, i32
  }
  func.func @transform_1(%arg0: i32) -> (i32, i32) {
    %c0_i32 = arith.constant 0 : i32
    %c0_i32_0 = arith.constant 0 : i32
    %c0_i32_1 = arith.constant 0 : i32
    return %c0_i32, %c0_i32_0 : i32, i32
  }
  func.func @transform_2(%arg0: i32) -> (i32, i32) {
    %c0_i32 = arith.constant 0 : i32
    %c0_i32_0 = arith.constant 0 : i32
    %c0_i32_1 = arith.constant 0 : i32
    return %c0_i32, %c0_i32_0 : i32, i32
  }
  func.func @transform_3(%arg0: i32) -> (i32, i32, i32) {
    %c0_i32 = arith.constant 0 : i32
    %c0_i32_0 = arith.constant 0 : i32
    %c0_i32_1 = arith.constant 0 : i32
    %c0_i32_2 = arith.constant 0 : i32
    return %c0_i32, %c0_i32_0, %c0_i32_1 : i32, i32, i32
  }
  func.func @transform_4(%arg0: i32) -> (i32, i32) {
    %c0_i32 = arith.constant 0 : i32
    %c0_i32_0 = arith.constant 0 : i32
    %c0_i32_1 = arith.constant 0 : i32
    return %c0_i32, %c0_i32_0 : i32, i32
  }
  func.func @transform_5(%arg0: i32) -> (i32, i32) {
    %c0_i32 = arith.constant 0 : i32
    %c0_i32_0 = arith.constant 0 : i32
    %c0_i32_1 = arith.constant 0 : i32
    return %c0_i32, %c0_i32_0 : i32, i32
  }
}

</mosaic_0001>

<bundles_post_ra>
// kernel: tpu_custom_call.1
= control target key start
LH: loop header
LB: loop body
LE: loop exit
PB: predicated region body
PF: predicated region fallthrough
CT: control target
= control target key end

     0   :  { %11 = vsyncpa [#allocation3], 0  ;;  %s311_s0 = inlined_call_operand.hbm [shape: f32[2,4,256], index: 0, kind: input, shape index: {}]   ;;  %s312_s1 = inlined_call_operand.vmem [shape: f32[4,1], index: 1, kind: input, shape index: {}]   ;;  %s313_s2 = inlined_call_operand.vmem [shape: f32[4,1], index: 2, kind: input, shape index: {}]   ;;  %s314_s3 = inlined_call_operand.hbm [shape: f32[2,4,256], index: 3, kind: output, shape index: {0}]   ;;  %s315_s4 = inlined_call_operand.vmem [shape: f32[4,1], index: 4, kind: output, shape index: {1}]   ;;  %s316_s5 = inlined_call_operand.vmem [shape: f32[4,1], index: 5, kind: output, shape index: {2}]  }
   0x1   :  { %12 = vsyncpa [#allocation4], 0  ;;  %s205_s18 = smov [#allocation2]   ;;  %s157_s22 = scalar_lea.hbm %s311_s0, 256 }
   0x2   :  { %s18_s19 = sshll.u32 %s205_s18, 4  ;;  %p158_p0 = scmp.ne.s32.totalorder %s311_s0, %s157_s22  ;;  %s19_s19 = int_to_ptr.vmem [resolvable:$true] %s18_s19 }
   0x3   :  { %p161_p1 = scmp.lt.u32.totalorder %s157_s22, %s311_s0 }
   0x5   :  { %p163_p2 = pnand %p161_p1, %p158_p0 }
   0x7   :  { %166 = shalt.err (!%p163_p2)
}
   0x8   :  { %s167_s27 = scalar_lea.vmem %s19_s19, 256  ;;  %p172_p4 = scmp.lt.s32.totalorder %s19_s19, %s19_s19 }
   0x9   :  { %p168_p3 = scmp.ne.s32.totalorder %s19_s19, %s167_s27  ;;  %p173_p5 = scmp.lt.s32.totalorder %s167_s27, %s167_s27 }
   0xb   :  { %p174_p6 = por %p173_p5, %p172_p4 }
   0xd   :  { %p175_p7 = pnand %p174_p6, %p168_p3 }
   0xf   :  { %178 = shalt.err (!%p175_p7)
}
  0x10   :  { %s206_s28 = smov 128   ;;  %s207_s29 = smov 8  }
  0x11   :  { %24 = dma.hbm_to_vmem [thread:$0]  %s311_s0, 256, %s19_s19, [#allocation3], %s206_s28, %s206_s28, %s207_s29  }
  0x12   :  { %201 = dma.done.wait [#allocation3], 256  }
  0x13   :  { %202 = vsyncadd [#allocation3], 4294967040  ;;  %vm40_vm0 = vcmask 1043456   ;;  %v256_v0 = vld [vmem:[#allocation2] sm:$0xff]  ;;  %v258_v1 = vld [vmem:[#allocation2 + $0x8] sm:$0xff]  ;;  %v208_v20 = vmov 0   ;;  %v94_v45 = vlaneseq }
  0x14   :  { %v36_v2 = vcombine.high %v256_v0, %v256_v0  ;;  %v41_v3 = vsel %vm40_vm0, %v256_v0, 0.0  ;;  %v54_v4 = vmul.f32 %v256_v0, %v256_v0  ;;  %v37_v5 = vcombine.high %v258_v1, %v258_v1  ;;  %151 = vset.pattern.permute.xlu0 %v208_v20  ;;  %152 = vset.pattern.permute.xlu1 %v208_v20  ;;  %v82_v37 = vld [vmem:[%s312_s1] sm:$0xf]  ;;  %s210_s1 = smov [#allocation5]  }
  0x15   :  { %v46_v6 = vsel %vm40_vm0, %v258_v1, 0.0  ;;  %v55_v7 = vmul.f32 %v258_v1, %v258_v1  ;;  %vm117_vm1 = vcmask 3072   ;;  %v84_v40 = vld [vmem:[%s313_s2] sm:$0xf]  ;;  %v209_v43 = vmov 839922192  }
  0x16   :  { %v42_v8 = vsel %vm40_vm0, %v36_v2, 0.0  ;;  %v58_v9 = vcombine.high %v54_v4, %v54_v4  ;;  %v62_v10 = vsel %vm40_vm0, %v54_v4, 0.0  ;;  %v47_v11 = vsel %vm40_vm0, %v37_v5, 0.0 }
  0x17   :  { %v43_v12 = vadd.f32 %v42_v8, %v41_v3  ;;  %v59_v13 = vcombine.high %v55_v7, %v55_v7  ;;  %v67_v15 = vsel %vm40_vm0, %v55_v7, 0.0  ;;  %v48_v17 = vadd.f32 %v47_v11, %v46_v6 }
  0x18   :  { %v63_v14 = vsel %vm40_vm0, %v58_v9, 0.0  ;;  %v92_v44 = vunpack.c.l.s4 %v209_v43  ;;  %v95_v47 = vshrl.u32 %v94_v45, 7 }
  0x19   :  { %44 = vadd.xlane.f32.xlu0 %v43_v12  ;;  %v64_v16 = vadd.f32 %v63_v14, %v62_v10  ;;  %v68_v18 = vsel %vm40_vm0, %v59_v13, 0.0 }
  0x1a   :  { %v69_v19 = vadd.f32 %v68_v18, %v67_v15  ;;  %v93_v46 = vunpack.c.0.s8 %v92_v44 }
  0x1b   :  { %65 = vadd.xlane.f32.xlu1 %v64_v16 }
  0x1c   :  { %v96_v48 = vsub.s32 %v93_v46, %v95_v47 }
  0x1d   :  { %49 = vadd.xlane.f32.xlu0 %v48_v17 }
  0x1f   :  { %70 = vadd.xlane.f32.xlu1 %v69_v19 }
  0xa6   :  { %v45_v21 = vpop.xlane.xlu0 %44 }
  0xa7   :  { %v51_v24 = vsel %vm40_vm0, %v45_v21, 0.0 }
  0xa8   :  { %v66_v22 = vpop.xlane.xlu1 %65 }
  0xa9   :  { %v72_v28 = vsel %vm40_vm0, %v66_v22, 0.0 }
  0xaa   :  { %v50_v23 = vpop.xlane.xlu0 %49 }
  0xab   :  { %v52_v25 = vsel %vm40_vm0, %v50_v23, 0.0 }
  0xac   :  { %v53_v26 = vadd.f32 %v52_v25, %v51_v24  ;;  %v71_v27 = vpop.xlane.xlu1 %70 }
  0xad   :  { %v73_v29 = vsel %vm40_vm0, %v71_v27, 0.0 }
  0xae   :  { %v75_v30 = vmul.f32 0.001953125, %v53_v26  ;;  %v74_v31 = vadd.f32 %v73_v29, %v72_v28 }
  0xb0   :  { %118 = vst.msk [vmem:[%s315_s4] sm:$0xf] %vm117_vm1, %v75_v30  ;;  %v76_v32 = vmul.f32 0.001953125, %v74_v31  ;;  %v77_v33 = vmul.f32 %v75_v30, %v75_v30  ;;  %s125_s4 = sshll.u32 %s210_s1, 4  ;;  %s126_s4 = int_to_ptr.vmem [resolvable:$true] %s125_s4 }
  0xb1   :  { %s179_s2 = scalar_lea.vmem %s126_s4, 256  ;;  %p184_p9 = scmp.lt.s32.totalorder %s126_s4, %s126_s4 }
  0xb2   :  { %v78_v34 = vsub.f32 %v76_v32, %v77_v33  ;;  %p180_p8 = scmp.ne.s32.totalorder %s126_s4, %s179_s2  ;;  %p185_p10 = scmp.lt.s32.totalorder %s179_s2, %s179_s2 }
  0xb4   :  { %v79_v35 = vmax.f32 %v78_v34, 0.0  ;;  %p186_p11 = por %p185_p10, %p184_p9 }
  0xb6   :  { %v80_v36 = vadd.f32 1e-05, %v79_v35  ;;  %119 = vst.msk [vmem:[%s316_s5] sm:$0xf] %vm117_vm1, %v79_v35  ;;  %p187_p12 = pnand %p186_p11, %p180_p8 }
  0xb8   :  { %155 = vrsqrt.f32 %v80_v36 }
  0xc2   :  { %v156_v38 = vpop.eup %155 }
  0xc3   :  { %v83_v39 = vmul.f32 %v156_v38, %v82_v37 }
  0xc5   :  { %89 = vperm.xlu0 %151, %v83_v39   ;;  %v85_v41 = vmul.f32 %v83_v39, %v75_v30 }
  0xc7   :  { %v86_v42 = vsub.f32 %v84_v40, %v85_v41 }
  0xc9   :  { %103 = vperm.xlu1 %152, %v86_v42  }
 0x144   :  { %v90_v49 = vpop.permute.xlu0 %89 }
 0x145   :  { %v97_v50 = vrot.slane %v90_v49, %v96_v48 }
 0x147   :  { %v99_v52 = vmul.f32 %v97_v50, %v256_v0  ;;  %v100_v53 = vmul.f32 %v97_v50, %v258_v1 }
 0x148   :  { %v104_v51 = vpop.permute.xlu1 %103 }
 0x149   :  { %v111_v54 = vrot.slane %v104_v51, %v96_v48 }
 0x14b   :  { %v113_v55 = vadd.f32 %v111_v54, %v99_v52  ;;  %v114_v56 = vadd.f32 %v111_v54, %v100_v53 }
 0x14d   :  { %115 = vst [vmem:[#allocation5] sm:$0xff] %v113_v55  ;;  %116 = vst [vmem:[#allocation5 + $0x8] sm:$0xff] %v114_v56 }
 0x14e   :  { %190 = shalt.err (!%p187_p12)
}
 0x14f   :  { %s191_s15 = scalar_lea.hbm %s314_s3, 256 }
 0x150   :  { %p192_p13 = scmp.ne.s32.totalorder %s314_s3, %s191_s15  ;;  %p195_p0 = scmp.lt.u32.totalorder %s191_s15, %s314_s3 }
 0x152   :  { %p197_p1 = pnand %p195_p0, %p192_p13 }
 0x154   :  { %200 = shalt.err (!%p197_p1)
}
 0x155   :  { %131 = dma.vmem_to_hbm [thread:$0]  %s126_s4, 256, %s314_s3, [#allocation4], %s206_s28, %s206_s28, %s207_s29  }
 0x156   :  { %203 = dma.done.wait [#allocation4], 256  }
 0x157   :  { %204 = vsyncadd [#allocation4], 4294967040 }
 0x158   :  { %143 = vsyncpa [#allocation3], 1 }
 0x159   :  { %144 = vsyncpa [#allocation4], 1 }

</bundles_post_ra>
